<compile_context>
chip_gen: v7x
topology: tpu7x:2x2x1
jax: 0.10.0
libtpu: 0.0.40
codegen_flags: <defaults>
</compile_context>

<pallas_src>
import functools

import jax
import jax.numpy as jnp
import numpy as np
from jax import lax
from jax.experimental import pallas as pl
from jax.experimental.pallas import tpu as pltpu

LANES = 128
DEF_MAX_BLOCK_ROWS = 4096   # 4096x128 f32 y-block = 2 MiB of HBM per grid step
ACC_ROWS = 256              # 3 x (256,128) f32 accumulators = 384 KiB VMEM


def _pr_loss_kernel(y_ref, s_ref, out_ref, sy_acc, sym_acc, nm_acc, *,
                    rows, block_rows, acc_rows, steps, needs_mask):
    p = pl.program_id(0)    # "parallel" slice axis (split across TCs on v7x)
    j = pl.program_id(1)    # "arbitrary" reduction axis

    @pl.when(j == 0)
    def _init():
        sy_acc[...] = jnp.zeros_like(sy_acc)
        sym_acc[...] = jnp.zeros_like(sym_acc)
        nm_acc[...] = jnp.zeros_like(nm_acc)

    n_chunks = block_rows // acc_rows

    def _accumulate(valid_rows):
        # valid_rows is None (every row valid) or a traced scalar row count.
        if valid_rows is not None:
            row_id = lax.broadcasted_iota(jnp.int32, (acc_rows, LANES), 0)
        for c in range(n_chunks):                      # static, unrolled
            sl = pl.ds(c * acc_rows, acc_rows)
            y = y_ref[sl, :].astype(jnp.float32)
            is_m = s_ref[sl, :] == 1
            if valid_rows is not None:
                keep = row_id < (valid_rows - c * acc_rows)
                y = jnp.where(keep, y, 0.0)
                is_m = jnp.logical_and(keep, is_m)
            # Pure-VPU hot loop: 3 accumulators, no XLU, no transcendentals.
            sy_acc[...] += y                           # sum(y)
            sym_acc[...] += jnp.where(is_m, y, 0.0)    # sum(y[s == 1])
            nm_acc[...] += is_m.astype(jnp.float32)    # |s == 1|

    if not needs_mask:
        # Grid covers the rows exactly: every block is full and in bounds.
        _accumulate(None)
    else:
        # rows / steps / block_rows are static Python ints -> cheap scalar.
        valid = rows - (p * steps + j) * block_rows

        @pl.when(valid >= block_rows)          # fast path: full block, no mask
        def _full():
            _accumulate(None)

        @pl.when(jnp.logical_and(valid > 0, valid < block_rows))
        def _tail():                           # the single ragged block
            _accumulate(valid)
        # valid <= 0: block lies entirely past the data -> contribute nothing.

    @pl.when(j == pl.num_programs(1) - 1)
    def _finalize():
        # Cross-lane reductions (XLU) run once per slice, not per grid step.
        sum_all = jnp.sum(sy_acc[...])
        sum_m = jnp.sum(sym_acc[...])
        n_m = jnp.sum(nm_acc[...])
        lane = lax.broadcasted_iota(jnp.int32, (1, LANES), 1)
        out_ref[...] = (jnp.where(lane == 0, sum_all, 0.0)
                        + jnp.where(lane == 1, sum_m, 0.0)
                        + jnp.where(lane == 2, n_m, 0.0))


def pr_loss(y_pred, s, *, max_block_rows=DEF_MAX_BLOCK_ROWS):
    """Pallas implementation of PRLoss.forward(y_pred, s).

    Assumes the sensitive attribute `s` is binary (0 / 1), as in the
    reference module.  If a group is empty or a probability hits 0/1 the
    result is NaN/Inf, matching the PyTorch reference.
    """
    assert max_block_rows >= ACC_ROWS
    n_total = y_pred.shape[0]
    assert s.shape[0] == n_total

    # View the flat vectors as a (rows, 128) slab.  Only the sub-row ragged
    # tail is padded (y = 0, s = 0 -> contributes nothing to any statistic).
    rows = pl.cdiv(n_total, LANES)
    n_pad = rows * LANES
    y_flat, s_flat = y_pred, s
    if n_pad != n_total:
        pad = n_pad - n_total
        y_flat = jnp.pad(y_flat, (0, pad))
        s_flat = jnp.pad(s_flat, (0, pad))
    y2 = y_flat.reshape(rows, LANES)           # native dtype (f32 or bf16)
    s2 = s_flat.reshape(rows, LANES)           # native integer dtype (no cast)

    # Fixed-size accumulators decoupled from the block size.
    if rows <= ACC_ROWS:
        block_rows = rows
        acc_rows = rows
    else:
        acc_rows = ACC_ROWS
        block_rows = min((max_block_rows // ACC_ROWS) * ACC_ROWS,
                         (rows // ACC_ROWS) * ACC_ROWS)
    total_blocks = pl.cdiv(rows, block_rows)

    # Leading "parallel" axis: shards the row range across v7x's two
    # TensorCores; a plain outer loop on v5e / v6e (1 TC per chip).
    num_slices = 2 if total_blocks >= 2 else 1
    steps = pl.cdiv(total_blocks, num_slices)
    last_block = total_blocks - 1
    needs_mask = (num_slices * steps * block_rows) != rows

    kernel = functools.partial(
        _pr_loss_kernel, rows=rows, block_rows=block_rows,
        acc_rows=acc_rows, steps=steps, needs_mask=needs_mask)

    def _in_map(p_idx, j_idx):
        # Clamp so a (fully masked-out) trailing block of the last slice
        # never DMAs out of bounds.
        return (jnp.minimum(p_idx * steps + j_idx, last_block), 0)

    partial = pl.pallas_call(
        kernel,
        out_shape=jax.ShapeDtypeStruct((num_slices, LANES), jnp.float32),
        grid_spec=pltpu.PrefetchScalarGridSpec(
            num_scalar_prefetch=0,
            grid=(num_slices, steps),
            in_specs=[
                pl.BlockSpec((block_rows, LANES), _in_map),
                pl.BlockSpec((block_rows, LANES), _in_map),
            ],
            out_specs=pl.BlockSpec((1, LANES), lambda p_idx, j_idx: (p_idx, 0)),
            scratch_shapes=[pltpu.VMEM((acc_rows, LANES), jnp.float32)] * 3,
        ),
        compiler_params=pltpu.CompilerParams(
            dimension_semantics=("parallel", "arbitrary")),
        cost_estimate=pl.CostEstimate(
            flops=8 * n_total,
            transcendentals=0,
            bytes_accessed=n_pad * (y2.dtype.itemsize + s2.dtype.itemsize)),
    )(y2, s2)

    # Tiny scalar epilogue in plain JAX / f32 (one value per chip).
    sum_all = jnp.sum(partial[:, 0])           # sum of all predictions
    sum_m = jnp.sum(partial[:, 1])             # sum over the s == 1 group
    n_m = jnp.sum(partial[:, 2])               # |s == 1|
    n_f = jnp.float32(n_total) - n_m           # s is binary
    sum_f = sum_all - sum_m

    p_ys_f = sum_f / n_f                       # P_ys[1]
    p_ys_m = sum_m / n_m                       # P_ys[0]
    p_y = sum_all / jnp.float32(n_total)       # sum(cat(f, m)) / N

    p_s1y1 = jnp.log(p_ys_f) - jnp.log(p_y)
    p_s1y0 = jnp.log(1.0 - p_ys_f) - jnp.log(1.0 - p_y)
    p_s0y1 = jnp.log(p_ys_m) - jnp.log(p_y)
    p_s0y0 = jnp.log(1.0 - p_ys_m) - jnp.log(1.0 - p_y)

    # sum(output_f * c) == c * sum_f ; sum((1-output_f) * c) == c*(n_f-sum_f)
    pi = (sum_f * p_s1y1 + (n_f - sum_f) * p_s1y0
          + sum_m * p_s0y1 + (n_m - sum_m) * p_s0y0)
    return pi


def _pr_loss_reference_numpy(y_np, s_np):
    """Direct transcription of the PyTorch forward (numpy, float64)."""
    output_f = y_np[s_np == 0]
    output_m = y_np[s_np == 1]
    n_f = output_f.shape[0]
    n_m = output_m.shape[0]
    p_ys = np.array([output_m.sum() / n_m, output_f.sum() / n_f],
                    dtype=np.float64)
    p_y = np.concatenate((output_f, output_m), 0).sum() / y_np.shape[0]
    p_s1y1 = np.log(p_ys[1]) - np.log(p_y)
    p_s1y0 = np.log(1 - p_ys[1]) - np.log(1 - p_y)
    p_s0y1 = np.log(p_ys[0]) - np.log(p_y)
    p_s0y0 = np.log(1 - p_ys[0]) - np.log(1 - p_y)
    pi = ((output_f * p_s1y1).sum() + ((1 - output_f) * p_s1y0).sum()
          + (output_m * p_s0y1).sum() + ((1 - output_m) * p_s0y0).sum())
    return float(pi)


if __name__ == "__main__":
    key = jax.random.PRNGKey(0)
    k1, k2, k3, k4, k5 = jax.random.split(key, 5)

    # 1) Small case: single block, single slice, ragged sub-row tail.
    n_small = 300
    y_small = jax.nn.sigmoid(jax.random.normal(k1, (n_small,), jnp.float32))
    s_small = jax.random.bernoulli(k2, 0.5, (n_small,)).astype(jnp.int32)
    out_small = jax.block_until_ready(pr_loss(y_small, s_small))
    ref_small = _pr_loss_reference_numpy(
        np.asarray(y_small, dtype=np.float64), np.asarray(s_small))
    np.testing.assert_allclose(float(out_small), ref_small,
                               rtol=1e-4, atol=5e-4)

    # 2) Larger case: two parallel slices, masked ragged last block.
    n_big = 200_000
    y_big = jax.nn.sigmoid(jax.random.normal(k3, (n_big,), jnp.float32))
    s_big = (jax.random.uniform(k4, (n_big,)) < y_big).astype(jnp.int32)
    out_big = jax.block_until_ready(pr_loss(y_big, s_big))
    ref_big = _pr_loss_reference_numpy(
        np.asarray(y_big, dtype=np.float64), np.asarray(s_big))
    np.testing.assert_allclose(float(out_big), ref_big, rtol=2e-3, atol=1e-2)

    # 3) Same data, smaller blocks: exercises multiple reduction steps per
    #    slice (accumulator reset / finalize across the "arbitrary" axis).
    out_big2 = jax.block_until_ready(pr_loss(y_big, s_big, max_block_rows=512))
    np.testing.assert_allclose(float(out_big2), ref_big, rtol=2e-3, atol=1e-2)

    # 4) bf16 predictions stay bf16 in HBM; accumulation is f32 in-kernel.
    n_bf = 4096
    y_bf = jax.nn.sigmoid(jax.random.normal(k5, (n_bf,), jnp.float32)
                          ).astype(jnp.bfloat16)
    s_bf = (jax.random.uniform(k2, (n_bf,)) < 0.5).astype(jnp.int32)
    out_bf = jax.block_until_ready(pr_loss(y_bf, s_bf))
    ref_bf = _pr_loss_reference_numpy(
        np.asarray(y_bf).astype(np.float64), np.asarray(s_bf))
    np.testing.assert_allclose(float(out_bf), ref_bf, rtol=2e-3, atol=1e-2)

    print("KERNEL_OK")
</pallas_src>

<mosaic_0001>
module attributes {stable_mosaic.version = 11 : i64} {
  func.func @_pr_loss_kernel(%arg0: i32, %arg1: i32, %arg2: memref<3x128xf32, #tpu.memory_space<vmem>>, %arg3: memref<3x128xi32, #tpu.memory_space<vmem>>, %arg4: memref<1x128xf32, #tpu.memory_space<vmem>>, %arg5: memref<3x128xf32, #tpu.memory_space<vmem>>, %arg6: memref<3x128xf32, #tpu.memory_space<vmem>>, %arg7: memref<3x128xf32, #tpu.memory_space<vmem>>) attributes {dimension_semantics = [#tpu.dimension_semantics<parallel>, #tpu.dimension_semantics<arbitrary>], iteration_bounds = array<i64: 1, 1>, scalar_prefetch = 0 : i64, scratch_operands = 3 : i64, tpu.core_type = #tpu.core_type<tc>, window_params = [{transform_indices = @transform_0, window_bounds = array<i64: 3, 128>}, {transform_indices = @transform_1, window_bounds = array<i64: 3, 128>}, {transform_indices = @transform_2, window_bounds = array<i64: 1, 128>}]} {
    %c0_i32 = arith.constant 0 : i32
    %0 = arith.cmpi eq, %arg1, %c0_i32 : i32
    %1 = arith.extui %0 : i1 to i32
    %c0_i32_0 = arith.constant 0 : i32
    %2 = arith.cmpi ne, %1, %c0_i32_0 : i32
    scf.if %2 {
      %cst_18 = arith.constant 0.000000e+00 : f32
      %23 = vector.broadcast %cst_18 : f32 to vector<3x128xf32>
      %c0_19 = arith.constant 0 : index
      %c0_20 = arith.constant 0 : index
      %24 = vector.load %arg5[%c0_19, %c0_20] : memref<3x128xf32, #tpu.memory_space<vmem>>, vector<3x128xf32>
      tpu.vector_store %arg5[%c0_19, %c0_20], %23 {strides = array<i32>} : memref<3x128xf32, #tpu.memory_space<vmem>>, vector<3x128xf32>,
      %cst_21 = arith.constant 0.000000e+00 : f32
      %25 = vector.broadcast %cst_21 : f32 to vector<3x128xf32>
      %c0_22 = arith.constant 0 : index
      %c0_23 = arith.constant 0 : index
      %26 = vector.load %arg6[%c0_22, %c0_23] : memref<3x128xf32, #tpu.memory_space<vmem>>, vector<3x128xf32>
      tpu.vector_store %arg6[%c0_22, %c0_23], %25 {strides = array<i32>} : memref<3x128xf32, #tpu.memory_space<vmem>>, vector<3x128xf32>,
      %cst_24 = arith.constant 0.000000e+00 : f32
      %27 = vector.broadcast %cst_24 : f32 to vector<3x128xf32>
      %c0_25 = arith.constant 0 : index
      %c0_26 = arith.constant 0 : index
      %28 = vector.load %arg7[%c0_25, %c0_26] : memref<3x128xf32, #tpu.memory_space<vmem>>, vector<3x128xf32>
      tpu.vector_store %arg7[%c0_25, %c0_26], %27 {strides = array<i32>} : memref<3x128xf32, #tpu.memory_space<vmem>>, vector<3x128xf32>,
    } else {
    }
    %c0 = arith.constant 0 : index
    %c0_1 = arith.constant 0 : index
    %3 = vector.load %arg2[%c0, %c0_1] : memref<3x128xf32, #tpu.memory_space<vmem>>, vector<3x128xf32>
    %c0_2 = arith.constant 0 : index
    %c0_3 = arith.constant 0 : index
    %4 = vector.load %arg3[%c0_2, %c0_3] : memref<3x128xi32, #tpu.memory_space<vmem>>, vector<3x128xi32>
    %c1_i32 = arith.constant 1 : i32
    %5 = vector.broadcast %c1_i32 : i32 to vector<3x128xi32>
    %6 = arith.cmpi eq, %4, %5 : vector<3x128xi32>
    %c0_4 = arith.constant 0 : index
    %c0_5 = arith.constant 0 : index
    %7 = vector.load %arg5[%c0_4, %c0_5] : memref<3x128xf32, #tpu.memory_space<vmem>>, vector<3x128xf32>
    %8 = arith.addf %7, %3 : vector<3x128xf32>
    %c0_6 = arith.constant 0 : index
    %c0_7 = arith.constant 0 : index
    %9 = vector.load %arg5[%c0_6, %c0_7] : memref<3x128xf32, #tpu.memory_space<vmem>>, vector<3x128xf32>
    tpu.vector_store %arg5[%c0_6, %c0_7], %8 {strides = array<i32>} : memref<3x128xf32, #tpu.memory_space<vmem>>, vector<3x128xf32>,
    %c0_8 = arith.constant 0 : index
    %c0_9 = arith.constant 0 : index
    %10 = vector.load %arg6[%c0_8, %c0_9] : memref<3x128xf32, #tpu.memory_space<vmem>>, vector<3x128xf32>
    %cst = arith.constant 0.000000e+00 : f32
    %11 = vector.broadcast %cst : f32 to vector<3x128xf32>
    %12 = arith.select %6, %3, %11 : vector<3x128xi1>, vector<3x128xf32>
    %13 = arith.addf %10, %12 : vector<3x128xf32>
    %c0_10 = arith.constant 0 : index
    %c0_11 = arith.constant 0 : index
    %14 = vector.load %arg6[%c0_10, %c0_11] : memref<3x128xf32, #tpu.memory_space<vmem>>, vector<3x128xf32>
    tpu.vector_store %arg6[%c0_10, %c0_11], %13 {strides = array<i32>} : memref<3x128xf32, #tpu.memory_space<vmem>>, vector<3x128xf32>,
    %c0_12 = arith.constant 0 : index
    %c0_13 = arith.constant 0 : index
    %15 = vector.load %arg7[%c0_12, %c0_13] : memref<3x128xf32, #tpu.memory_space<vmem>>, vector<3x128xf32>
    %16 = arith.extui %6 : vector<3x128xi1> to vector<3x128xi32>
    %17 = arith.sitofp %16 : vector<3x128xi32> to vector<3x128xf32>
    %18 = arith.addf %15, %17 : vector<3x128xf32>
    %c0_14 = arith.constant 0 : index
    %c0_15 = arith.constant 0 : index
    %19 = vector.load %arg7[%c0_14, %c0_15] : memref<3x128xf32, #tpu.memory_space<vmem>>, vector<3x128xf32>
    tpu.vector_store %arg7[%c0_14, %c0_15], %18 {strides = array<i32>} : memref<3x128xf32, #tpu.memory_space<vmem>>, vector<3x128xf32>,
    %c0_i32_16 = arith.constant 0 : i32
    %20 = arith.cmpi eq, %arg1, %c0_i32_16 : i32
    %21 = arith.extui %20 : i1 to i32
    %c0_i32_17 = arith.constant 0 : i32
    %22 = arith.cmpi ne, %21, %c0_i32_17 : i32
    scf.if %22 {
      %c0_18 = arith.constant 0 : index
      %c0_19 = arith.constant 0 : index
      %23 = vector.load %arg5[%c0_18, %c0_19] : memref<3x128xf32, #tpu.memory_space<vmem>>, vector<3x128xf32>
      %24 = vector.shape_cast %23 : vector<3x128xf32> to vector<1x3x128xf32>
      %cst_20 = arith.constant dense<0.000000e+00> : vector<1xf32>
      %25 = vector.multi_reduction <add>, %24, %cst_20 [1, 2] : vector<1x3x128xf32> to vector<1xf32>
      %26 = vector.shape_cast %25 : vector<1xf32> to vector<1x1x1xf32>
      %27 = vector.extract %26[0, 0, 0] : f32 from vector<1x1x1xf32>
      %c0_21 = arith.constant 0 : index
      %c0_22 = arith.constant 0 : index
      %28 = vector.load %arg6[%c0_21, %c0_22] : memref<3x128xf32, #tpu.memory_space<vmem>>, vector<3x128xf32>
      %29 = vector.shape_cast %28 : vector<3x128xf32> to vector<1x3x128xf32>
      %cst_23 = arith.constant dense<0.000000e+00> : vector<1xf32>
      %30 = vector.multi_reduction <add>, %29, %cst_23 [1, 2] : vector<1x3x128xf32> to vector<1xf32>
      %31 = vector.shape_cast %30 : vector<1xf32> to vector<1x1x1xf32>
      %32 = vector.extract %31[0, 0, 0] : f32 from vector<1x1x1xf32>
      %c0_24 = arith.constant 0 : index
      %c0_25 = arith.constant 0 : index
      %33 = vector.load %arg7[%c0_24, %c0_25] : memref<3x128xf32, #tpu.memory_space<vmem>>, vector<3x128xf32>
      %34 = vector.shape_cast %33 : vector<3x128xf32> to vector<1x3x128xf32>
      %cst_26 = arith.constant dense<0.000000e+00> : vector<1xf32>
      %35 = vector.multi_reduction <add>, %34, %cst_26 [1, 2] : vector<1x3x128xf32> to vector<1xf32>
      %36 = vector.shape_cast %35 : vector<1xf32> to vector<1x1x1xf32>
      %37 = vector.extract %36[0, 0, 0] : f32 from vector<1x1x1xf32>
      %38 = tpu.iota {dimensions = array<i32: 1>} : vector<1x128xi32>
      %c0_i32_27 = arith.constant 0 : i32
      %39 = vector.broadcast %c0_i32_27 : i32 to vector<1x128xi32>
      %40 = arith.cmpi eq, %38, %39 : vector<1x128xi32>
      %cst_28 = arith.constant 0.000000e+00 : f32
      %41 = vector.broadcast %27 : f32 to vector<1x128xf32>
      %42 = vector.broadcast %cst_28 : f32 to vector<1x128xf32>
      %43 = arith.select %40, %41, %42 : vector<1x128xi1>, vector<1x128xf32>
      %c1_i32_29 = arith.constant 1 : i32
      %44 = vector.broadcast %c1_i32_29 : i32 to vector<1x128xi32>
      %45 = arith.cmpi eq, %38, %44 : vector<1x128xi32>
      %cst_30 = arith.constant 0.000000e+00 : f32
      %46 = vector.broadcast %32 : f32 to vector<1x128xf32>
      %47 = vector.broadcast %cst_30 : f32 to vector<1x128xf32>
      %48 = arith.select %45, %46, %47 : vector<1x128xi1>, vector<1x128xf32>
      %49 = arith.addf %43, %48 : vector<1x128xf32>
      %c2_i32 = arith.constant 2 : i32
      %50 = vector.broadcast %c2_i32 : i32 to vector<1x128xi32>
      %51 = arith.cmpi eq, %38, %50 : vector<1x128xi32>
      %cst_31 = arith.constant 0.000000e+00 : f32
      %52 = vector.broadcast %37 : f32 to vector<1x128xf32>
      %53 = vector.broadcast %cst_31 : f32 to vector<1x128xf32>
      %54 = arith.select %51, %52, %53 : vector<1x128xi1>, vector<1x128xf32>
      %55 = arith.addf %49, %54 : vector<1x128xf32>
      %c0_32 = arith.constant 0 : index
      %c0_33 = arith.constant 0 : index
      %56 = vector.load %arg4[%c0_32, %c0_33] : memref<1x128xf32, #tpu.memory_space<vmem>>, vector<1x128xf32>
      tpu.vector_store %arg4[%c0_32, %c0_33], %55 {strides = array<i32>} : memref<1x128xf32, #tpu.memory_space<vmem>>, vector<1x128xf32>,
    } else {
    }
    return
  }
  func.func @transform_0(%arg0: i32, %arg1: i32) -> (i32, i32) {
    %c1_i32 = arith.constant 1 : i32
    %0 = arith.muli %arg0, %c1_i32 : i32
    %1 = arith.addi %0, %arg1 : i32
    %c0_i32 = arith.constant 0 : i32
    %2 = arith.minsi %1, %c0_i32 : i32
    %c0_i32_0 = arith.constant 0 : i32
    %c0_i32_1 = arith.constant 0 : i32
    return %2, %c0_i32_0 : i32, i32
  }
  func.func @transform_1(%arg0: i32, %arg1: i32) -> (i32, i32) {
    %c1_i32 = arith.constant 1 : i32
    %0 = arith.muli %arg0, %c1_i32 : i32
    %1 = arith.addi %0, %arg1 : i32
    %c0_i32 = arith.constant 0 : i32
    %2 = arith.minsi %1, %c0_i32 : i32
    %c0_i32_0 = arith.constant 0 : i32
    %c0_i32_1 = arith.constant 0 : i32
    return %2, %c0_i32_0 : i32, i32
  }
  func.func @transform_2(%arg0: i32, %arg1: i32) -> (i32, i32) {
    %c0_i32 = arith.constant 0 : i32
    %c0_i32_0 = arith.constant 0 : i32
    return %arg0, %c0_i32 : i32, i32
  }
}

</mosaic_0001>

<bundles_post_ra>
// kernel: tpu_custom_call.1
= control target key start
LH: loop header
LB: loop body
LE: loop exit
PB: predicated region body
PF: predicated region fallthrough
CT: control target
= control target key end

     0   :  { %7 = vsyncpa [#allocation6], 0  ;;  %s283_s0 = inlined_call_operand.hbm [shape: f32[3,128], index: 0, kind: input, shape index: {}]   ;;  %s284_s1 = inlined_call_operand.hbm [shape: s32[3,128], index: 1, kind: input, shape index: {}]   ;;  %s285_s2 = inlined_call_operand.hbm [shape: f32[1,128], index: 2, kind: output, shape index: {}]  }
   0x1   :  { %8 = vsyncpa [#allocation9], 0 }
   0x2   :  { %9 = vsyncpa [#allocation7], 0  ;;  %s228_s9 = smov [#allocation5]   ;;  %s229_s11 = smov [#allocation8]  }
   0x3   :  { %s21_s10 = sshll.u32 %s228_s9, 4  ;;  %s36_s12 = sshll.u32 %s229_s11, 4  ;;  %s22_s10 = int_to_ptr.vmem [resolvable:$true] %s21_s10  ;;  %s37_s12 = int_to_ptr.vmem [resolvable:$true] %s36_s12 }
   0x4   :  { %s156_s15 = scalar_lea.hbm %s283_s0, 64 }
   0x5   :  { %p157_p0 = scmp.ne.s32.totalorder %s283_s0, %s156_s15  ;;  %p160_p1 = scmp.lt.u32.totalorder %s156_s15, %s283_s0 }
   0x7   :  { %p162_p2 = pnand %p160_p1, %p157_p0 }
   0x9   :  { %165 = shalt.err (!%p162_p2)
}
   0xa   :  { %s166_s20 = scalar_lea.vmem %s22_s10, 64  ;;  %p171_p4 = scmp.lt.s32.totalorder %s22_s10, %s22_s10 }
   0xb   :  { %p167_p3 = scmp.ne.s32.totalorder %s22_s10, %s166_s20  ;;  %p172_p5 = scmp.lt.s32.totalorder %s166_s20, %s166_s20 }
   0xd   :  { %p173_p6 = por %p172_p5, %p171_p4 }
   0xf   :  { %p174_p7 = pnand %p173_p6, %p167_p3 }
  0x11   :  { %177 = shalt.err (!%p174_p7)
}
  0x12   :  { %24 = dma.hbm_to_vmem [thread:$0]  %s283_s0, 64, %s22_s10, [#allocation6]  }
  0x13   :  { %s178_s25 = scalar_lea.hbm %s284_s1, 64 }
  0x14   :  { %p179_p8 = scmp.ne.s32.totalorder %s284_s1, %s178_s25  ;;  %p182_p9 = scmp.lt.u32.totalorder %s178_s25, %s284_s1 }
  0x16   :  { %p184_p10 = pnand %p182_p9, %p179_p8 }
  0x18   :  { %187 = shalt.err (!%p184_p10)
}
  0x19   :  { %s188_s30 = scalar_lea.vmem %s37_s12, 64  ;;  %p193_p12 = scmp.lt.s32.totalorder %s37_s12, %s37_s12 }
  0x1a   :  { %p189_p11 = scmp.ne.s32.totalorder %s37_s12, %s188_s30  ;;  %p194_p13 = scmp.lt.s32.totalorder %s188_s30, %s188_s30 }
  0x1c   :  { %p195_p0 = por %p194_p13, %p193_p12 }
  0x1e   :  { %p196_p1 = pnand %p195_p0, %p189_p11 }
  0x20   :  { %199 = shalt.err (!%p196_p1)
}
  0x21   :  { %39 = dma.hbm_to_vmem [thread:$0]  %s284_s1, 64, %s37_s12, [#allocation9]  }
  0x22   :  { %222 = dma.done.wait [#allocation6], 64  }
  0x23   :  { %223 = vsyncadd [#allocation6], 4294967232 }
  0x24   :  { %224 = dma.done.wait [#allocation9], 64  }
  0x25   :  { %225 = vsyncadd [#allocation9], 4294967232  ;;  %v230_v0 = vmov 0.0   ;;  %v59_v1 = vld [vmem:[#allocation5] sm:$0x7]  ;;  %vm78_vm1 = vcmask 1042432   ;;  %v111_v38 = vlaneseq }
  0x26   :  { %56 = vst [vmem:[#allocation2] sm:$0x7] %v230_v0  ;;  %57 = vst [vmem:[#allocation3] sm:$0x7] %v230_v0  ;;  %v60_v2 = vld [vmem:[#allocation8] sm:$0x7] }
  0x27   :  { %58 = vst [vmem:[#allocation4] sm:$0x7] %v230_v0  ;;  %vm61_vm0 = vcmp.eq.s32.totalorder %v60_v2, 1  ;;  %v112_v39 = vand.u32 127, %v111_v38  ;;  %s231_s6 = smov [#allocation10]  }
  0x28   :  { %v145_v6 = vsel %vm61_vm0, 1.0, %v230_v0  ;;  %v66_v8 = vsel %vm61_vm0, %v59_v1, 0.0  ;;  %s131_s7 = sshll.u32 %s231_s6, 4  ;;  %s132_s7 = int_to_ptr.vmem [resolvable:$true] %s131_s7 }
  0x29   :  { %vm113_vm2 = vcmp.eq.s32.totalorder %v112_v39, 0  ;;  %vm116_vm3 = vcmp.eq.s32.totalorder %v112_v39, 1  ;;  %vm120_vm4 = vcmp.eq.s32.totalorder %v112_v39, 2  ;;  %s200_s8 = scalar_lea.vmem %s132_s7, 16  ;;  %s204_s9 = scalar_lea.vmem %s132_s7, 32 }
  0x2a   :  { %p201_p2 = scmp.ne.s32.totalorder %s132_s7, %s200_s8  ;;  %p205_p3 = scmp.lt.s32.totalorder %s132_s7, %s132_s7 }
  0x2b   :  { %p206_p4 = scmp.lt.s32.totalorder %s204_s9, %s200_s8 }
  0x2d   :  { %v62_v3 = vld [vmem:[#allocation2] sm:$0x7]  ;;  %v65_v7 = vld [vmem:[#allocation3] sm:$0x7]  ;;  %p207_p5 = por %p206_p4, %p205_p3 }
  0x2e   :  { %v69_v4 = vld [vmem:[#allocation4] sm:$0x7]  ;;  %v63_v5 = vadd.f32 %v62_v3, %v59_v1  ;;  %v67_v10 = vadd.f32 %v66_v8, %v65_v7 }
  0x2f   :  { %v72_v9 = vadd.f32 %v145_v6, %v69_v4  ;;  %p208_p6 = pnand %p207_p5, %p201_p2 }
  0x30   :  { %64 = vst [vmem:[#allocation2] sm:$0x7] %v63_v5  ;;  %68 = vst [vmem:[#allocation3] sm:$0x7] %v67_v10 }
  0x31   :  { %73 = vst [vmem:[#allocation4] sm:$0x7] %v72_v9 }
  0x37   :  { %v77_v11 = vld [vmem:[#allocation2] sm:$0x7]  ;;  %v89_v14 = vld [vmem:[#allocation3] sm:$0x7] }
  0x38   :  { %v79_v12 = vsel %vm78_vm1, %v77_v11, 0.0  ;;  %v100_v13 = vld [vmem:[#allocation4] sm:$0x7]  ;;  %v90_v16 = vsel %vm78_vm1, %v89_v14, 0.0 }
  0x39   :  { %80 = vadd.xlane.f32.xlu0 %v79_v12  ;;  %v101_v15 = vsel %vm78_vm1, %v100_v13, 0.0 }
  0x3a   :  { %102 = vadd.xlane.f32.xlu1 %v101_v15 }
  0x3d   :  { %91 = vadd.xlane.f32.xlu0 %v90_v16 }
  0xc6   :  { %v81_v17 = vpop.xlane.xlu0 %80 }
  0xc7   :  { %v82_v18 = vrot.slane %v81_v17, 4  ;;  %v103_v19 = vpop.xlane.xlu1 %102 }
  0xc8   :  { %v104_v20 = vrot.slane %v103_v19, 4 }
  0xc9   :  { %v83_v21 = vadd.f32 %v82_v18, %v81_v17 }
  0xca   :  { %v105_v22 = vadd.f32 %v104_v20, %v103_v19  ;;  %v92_v23 = vpop.xlane.xlu0 %91 }
  0xcb   :  { %v84_v24 = vrot.slane %v83_v21, 2  ;;  %v93_v25 = vrot.slane %v92_v23, 4 }
  0xcc   :  { %v106_v26 = vrot.slane %v105_v22, 2 }
  0xcd   :  { %v94_v27 = vadd.f32 %v93_v25, %v92_v23  ;;  %v85_v28 = vadd.f32 %v84_v24, %v83_v21 }
  0xce   :  { %v107_v29 = vadd.f32 %v106_v26, %v105_v22 }
  0xcf   :  { %v95_v30 = vrot.slane %v94_v27, 2  ;;  %v86_v31 = vrot.slane %v85_v28, 1 }
  0xd0   :  { %v108_v34 = vrot.slane %v107_v29, 1 }
  0xd1   :  { %v96_v32 = vadd.f32 %v95_v30, %v94_v27  ;;  %v87_v33 = vadd.f32 %v86_v31, %v85_v28 }
  0xd2   :  { %v109_v37 = vadd.f32 %v108_v34, %v107_v29 }
  0xd3   :  { %146 = vpush %v87_v33  ;;  %v97_v35 = vrot.slane %v96_v32, 1 }
  0xd5   :  { %v98_v36 = vadd.f32 %v97_v35, %v96_v32 }
  0xd7   :  { %148 = vpush %v98_v36 }
  0xd8   :  { %150 = vpush %v109_v37 }
 0x104   :  { %s147_s1 = spop %146 }
 0x105   :  { %v114_v40 = vstv %s147_s1 }
 0x106   :  { %v115_v42 = vsel %vm113_vm2, %v114_v40, 0.0 }
 0x108   :  { %s149_s4 = spop %148 }
 0x109   :  { %v117_v41 = vstv %s149_s4  ;;  %s151_s5 = spop %150 }
 0x10a   :  { %v118_v43 = vsel %vm116_vm3, %v117_v41, 0.0  ;;  %v121_v44 = vstv %s151_s5 }
 0x10b   :  { %v119_v45 = vadd.f32 %v118_v43, %v115_v42  ;;  %v122_v46 = vsel %vm120_vm4, %v121_v44, 0.0 }
 0x10d   :  { %v123_v47 = vadd.f32 %v122_v46, %v119_v45 }
 0x10f   :  { %124 = vst [vmem:[#allocation10] sm:$0x1] %v123_v47 }
 0x110   :  { %211 = shalt.err (!%p208_p6)
}
 0x111   :  { %s212_s12 = scalar_lea.hbm %s285_s2, 16 }
 0x112   :  { %p213_p7 = scmp.ne.s32.totalorder %s285_s2, %s212_s12  ;;  %p216_p8 = scmp.lt.u32.totalorder %s212_s12, %s285_s2 }
 0x114   :  { %p218_p9 = pnand %p216_p8, %p213_p7 }
 0x116   :  { %221 = shalt.err (!%p218_p9)
}
 0x117   :  { %134 = dma.vmem_to_hbm [thread:$0]  %s132_s7, 16, %s285_s2, [#allocation7]  }
 0x118   :  { %226 = dma.done.wait [#allocation7], 16  }
 0x119   :  { %227 = vsyncadd [#allocation7], 4294967280 }
 0x11a   :  { %138 = vsyncpa [#allocation6], 1 }
 0x11b   :  { %139 = vsyncpa [#allocation9], 1 }
 0x11c   :  { %140 = vsyncpa [#allocation7], 1 }

</bundles_post_ra>
